<compile_context>
chip_gen: v7x
topology: tpu7x:2x2x1
jax: 0.10.0
libtpu: 0.0.40
codegen_flags: <defaults>
</compile_context>

<pallas_src>
import functools

import jax
import jax.numpy as jnp
from jax.experimental import pallas as pl
from jax.experimental.pallas import tpu as pltpu


def _conv3x3_relu_kernel(x_ref, w_ref, b_ref, o_ref, *, Wp):
    # x_ref : (1, Cin, Lin)  zero-padded image, (h, w) flattened onto lanes
    # w_ref : (9, COt, Cin)  per-tap weight matrices, tap index t = kh*3 + kw
    # b_ref : (COt, 1)       bias column
    # o_ref : (1, COt, L)    L = H*Wp flat output (2 junk pad columns per row,
    #                        sliced off by the wrapper)
    cout_t = o_ref.shape[1]
    L = o_ref.shape[2]

    acc = jnp.zeros((cout_t, L), jnp.float32)
    for kh in range(3):
        for kw in range(3):
            s = kh * Wp + kw                       # static lane offset of this tap
            acc += jnp.dot(w_ref[kh * 3 + kw],     # (COt, Cin)
                           x_ref[0, :, s:s + L],   # (Cin, L), zero-copy slice
                           preferred_element_type=jnp.float32)
    acc += b_ref[...]                              # (COt, 1) broadcast over lanes
    o_ref[0] = jnp.maximum(acc, 0.0).astype(o_ref.dtype)


def _choose_cout_tile(Cout, Cin, L, Lin, vmem_budget_bytes=8 * 1024 * 1024):
    """Largest Cout tile (multiple of 8 dividing Cout) whose double-buffered
    blocks fit a conservative VMEM budget; single tile for small/odd Cout."""
    if Cout % 8 != 0:
        return Cout
    cands = [c for c in range(8, Cout + 1, 8) if Cout % c == 0]

    def blocks_bytes(c):
        x_b = Cin * Lin * 4
        w_b = 9 * c * Cin * 4
        o_b = c * L * 4
        return 2 * (x_b + w_b + o_b)               # incl. double buffering

    fit = [c for c in cands if blocks_bytes(c) <= vmem_budget_bytes]
    return max(fit) if fit else min(cands)


def single_conv_forward(x_nchw, weight, bias, *, cout_tile=None):
    """Conv2d(in_ch, out_ch, 3, padding=1) + ReLU.

    x_nchw: (N, Cin, H, W); weight: (Cout, Cin, 3, 3) (PyTorch OIHW); bias: (Cout,).
    Returns (N, Cout, H, W), matching the PyTorch module's forward exactly.
    """
    N, Cin, H, W = x_nchw.shape
    Cout = weight.shape[0]
    Wp = W + 2                      # padded row length
    L = H * Wp                      # flat output columns per channel
    Lin = (H + 3) * Wp              # padded rows: 1 top + 2 bottom; the extra
                                    # bottom row keeps the largest tap offset
                                    # (2*Wp + 2) in-bounds — it only feeds the
                                    # junk pad columns that get sliced off.

    # Single pad + reshape; no transposes anywhere (stays channel-major).
    x_flat = jnp.pad(x_nchw, ((0, 0), (0, 0), (1, 2), (1, 1))).reshape(N, Cin, Lin)

    # OIHW -> (tap, Cout, Cin) with tap = kh*3 + kw (cross-correlation, as nn.Conv2d).
    w_taps = jnp.transpose(weight, (2, 3, 0, 1)).reshape(9, Cout, Cin)
    b_col = bias.reshape(Cout, 1)

    if cout_tile is None:
        cout_tile = _choose_cout_tile(Cout, Cin, L, Lin)
    assert Cout % cout_tile == 0, "cout_tile must divide Cout"
    n_co = Cout // cout_tile

    out_flat = pl.pallas_call(
        functools.partial(_conv3x3_relu_kernel, Wp=Wp),
        out_shape=jax.ShapeDtypeStruct((N, Cout, L), x_nchw.dtype),
        grid_spec=pltpu.PrefetchScalarGridSpec(
            num_scalar_prefetch=0,
            grid=(N, n_co),
            in_specs=[
                # Whole flat padded image; index_map ignores the Cout-tile axis,
                # so the block is DMA'd once per image and stays resident.
                pl.BlockSpec((1, Cin, Lin), lambda n, co: (n, 0, 0)),
                pl.BlockSpec((9, cout_tile, Cin), lambda n, co: (0, co, 0)),
                pl.BlockSpec((cout_tile, 1), lambda n, co: (co, 0)),
            ],
            out_specs=pl.BlockSpec((1, cout_tile, L), lambda n, co: (n, co, 0)),
        ),
        compiler_params=pltpu.CompilerParams(
            dimension_semantics=("parallel", "parallel"),
            vmem_limit_bytes=32 * 1024 * 1024),
    )(x_flat, w_taps, b_col)

    # (N, Cout, H*Wp) -> (N, Cout, H, Wp) -> drop the two pad columns -> NCHW.
    return out_flat.reshape(N, Cout, H, Wp)[:, :, :, :W]


if __name__ == "__main__":
    key = jax.random.PRNGKey(0)
    kx, kw, kb = jax.random.split(key, 3)

    N, Cin, H, W = 2, 4, 16, 16
    Cout = 8

    x = jax.random.normal(kx, (N, Cin, H, W), dtype=jnp.float32)
    # Deterministic init mimicking PyTorch's default uniform(-1/sqrt(fan_in), +..).
    fan_in = Cin * 3 * 3
    bound = 1.0 / jnp.sqrt(fan_in)
    weight = jax.random.uniform(kw, (Cout, Cin, 3, 3), jnp.float32, -bound, bound)
    bias = jax.random.uniform(kb, (Cout,), jnp.float32, -bound, bound)

    # jit so the pad/reshape/slice plumbing fuses into as few HBM passes as possible.
    fwd = jax.jit(single_conv_forward)
    out = jax.block_until_ready(fwd(x, weight, bias))

    # Reference check against XLA conv (same semantics as nn.Conv2d + ReLU).
    ref = jax.lax.conv_general_dilated(
        x, weight, window_strides=(1, 1), padding=((1, 1), (1, 1)),
        dimension_numbers=("NCHW", "OIHW", "NCHW"))
    ref = jnp.maximum(ref + bias[None, :, None, None], 0.0)
    assert out.shape == (N, Cout, H, W)
    assert jnp.allclose(out, ref, atol=1e-5, rtol=1e-5)

    print("KERNEL_OK")
</pallas_src>

<mosaic_0001>
module attributes {stable_mosaic.version = 11 : i64} {
  func.func @_conv3x3_relu_kernel(%arg0: i32, %arg1: i32, %arg2: memref<1x4x342xf32, #tpu.memory_space<vmem>>, %arg3: memref<9x8x4xf32, #tpu.memory_space<vmem>>, %arg4: memref<8x1xf32, #tpu.memory_space<vmem>>, %arg5: memref<1x8x288xf32, #tpu.memory_space<vmem>>) attributes {dimension_semantics = [#tpu.dimension_semantics<parallel>, #tpu.dimension_semantics<parallel>], iteration_bounds = array<i64: 2, 1>, scalar_prefetch = 0 : i64, scratch_operands = 0 : i64, tpu.core_type = #tpu.core_type<tc>, window_params = [{transform_indices = @transform_0, window_bounds = array<i64: 1, 4, 342>}, {transform_indices = @transform_1, window_bounds = array<i64: 9, 8, 4>}, {transform_indices = @transform_2, window_bounds = array<i64: 8, 1>}, {transform_indices = @transform_3, window_bounds = array<i64: 1, 8, 288>}]} {
    %cst = arith.constant 0.000000e+00 : f32
    %0 = vector.broadcast %cst : f32 to vector<8x288xf32>
    %c0 = arith.constant 0 : index
    %c0_0 = arith.constant 0 : index
    %c0_1 = arith.constant 0 : index
    %1 = vector.load %arg3[%c0, %c0_0, %c0_1] : memref<9x8x4xf32, #tpu.memory_space<vmem>>, vector<1x8x4xf32>
    %2 = vector.shape_cast %1 : vector<1x8x4xf32> to vector<8x4xf32>
    %c0_2 = arith.constant 0 : index
    %c0_3 = arith.constant 0 : index
    %c0_4 = arith.constant 0 : index
    %3 = vector.load %arg2[%c0_2, %c0_3, %c0_4] : memref<1x4x342xf32, #tpu.memory_space<vmem>>, vector<1x4x288xf32>
    %4 = vector.shape_cast %3 : vector<1x4x288xf32> to vector<4x288xf32>
    %cst_5 = arith.constant dense<0.000000e+00> : vector<8x288xf32>
    %5 = tpu.matmul %2, %4, %cst_5 {dimension_numbers = #tpu.dot_dimension_numbers<[1], [0], [0], [1], [0, 0, 1, 1], [], []>} : vector<8x4xf32>, vector<4x288xf32>, vector<8x288xf32> -> vector<8x288xf32>
    %6 = arith.addf %0, %5 : vector<8x288xf32>
    %c1 = arith.constant 1 : index
    %c0_6 = arith.constant 0 : index
    %c0_7 = arith.constant 0 : index
    %7 = vector.load %arg3[%c1, %c0_6, %c0_7] : memref<9x8x4xf32, #tpu.memory_space<vmem>>, vector<1x8x4xf32>
    %8 = vector.shape_cast %7 : vector<1x8x4xf32> to vector<8x4xf32>
    %c0_8 = arith.constant 0 : index
    %c0_9 = arith.constant 0 : index
    %c1_10 = arith.constant 1 : index
    %9 = vector.load %arg2[%c0_8, %c0_9, %c1_10] : memref<1x4x342xf32, #tpu.memory_space<vmem>>, vector<1x4x288xf32>
    %10 = vector.shape_cast %9 : vector<1x4x288xf32> to vector<4x288xf32>
    %cst_11 = arith.constant dense<0.000000e+00> : vector<8x288xf32>
    %11 = tpu.matmul %8, %10, %cst_11 {dimension_numbers = #tpu.dot_dimension_numbers<[1], [0], [0], [1], [0, 0, 1, 1], [], []>} : vector<8x4xf32>, vector<4x288xf32>, vector<8x288xf32> -> vector<8x288xf32>
    %12 = arith.addf %6, %11 : vector<8x288xf32>
    %c2 = arith.constant 2 : index
    %c0_12 = arith.constant 0 : index
    %c0_13 = arith.constant 0 : index
    %13 = vector.load %arg3[%c2, %c0_12, %c0_13] : memref<9x8x4xf32, #tpu.memory_space<vmem>>, vector<1x8x4xf32>
    %14 = vector.shape_cast %13 : vector<1x8x4xf32> to vector<8x4xf32>
    %c0_14 = arith.constant 0 : index
    %c0_15 = arith.constant 0 : index
    %c2_16 = arith.constant 2 : index
    %15 = vector.load %arg2[%c0_14, %c0_15, %c2_16] : memref<1x4x342xf32, #tpu.memory_space<vmem>>, vector<1x4x288xf32>
    %16 = vector.shape_cast %15 : vector<1x4x288xf32> to vector<4x288xf32>
    %cst_17 = arith.constant dense<0.000000e+00> : vector<8x288xf32>
    %17 = tpu.matmul %14, %16, %cst_17 {dimension_numbers = #tpu.dot_dimension_numbers<[1], [0], [0], [1], [0, 0, 1, 1], [], []>} : vector<8x4xf32>, vector<4x288xf32>, vector<8x288xf32> -> vector<8x288xf32>
    %18 = arith.addf %12, %17 : vector<8x288xf32>
    %c3 = arith.constant 3 : index
    %c0_18 = arith.constant 0 : index
    %c0_19 = arith.constant 0 : index
    %19 = vector.load %arg3[%c3, %c0_18, %c0_19] : memref<9x8x4xf32, #tpu.memory_space<vmem>>, vector<1x8x4xf32>
    %20 = vector.shape_cast %19 : vector<1x8x4xf32> to vector<8x4xf32>
    %c0_20 = arith.constant 0 : index
    %c0_21 = arith.constant 0 : index
    %c18 = arith.constant 18 : index
    %21 = vector.load %arg2[%c0_20, %c0_21, %c18] : memref<1x4x342xf32, #tpu.memory_space<vmem>>, vector<1x4x288xf32>
    %22 = vector.shape_cast %21 : vector<1x4x288xf32> to vector<4x288xf32>
    %cst_22 = arith.constant dense<0.000000e+00> : vector<8x288xf32>
    %23 = tpu.matmul %20, %22, %cst_22 {dimension_numbers = #tpu.dot_dimension_numbers<[1], [0], [0], [1], [0, 0, 1, 1], [], []>} : vector<8x4xf32>, vector<4x288xf32>, vector<8x288xf32> -> vector<8x288xf32>
    %24 = arith.addf %18, %23 : vector<8x288xf32>
    %c4 = arith.constant 4 : index
    %c0_23 = arith.constant 0 : index
    %c0_24 = arith.constant 0 : index
    %25 = vector.load %arg3[%c4, %c0_23, %c0_24] : memref<9x8x4xf32, #tpu.memory_space<vmem>>, vector<1x8x4xf32>
    %26 = vector.shape_cast %25 : vector<1x8x4xf32> to vector<8x4xf32>
    %c0_25 = arith.constant 0 : index
    %c0_26 = arith.constant 0 : index
    %c19 = arith.constant 19 : index
    %27 = vector.load %arg2[%c0_25, %c0_26, %c19] : memref<1x4x342xf32, #tpu.memory_space<vmem>>, vector<1x4x288xf32>
    %28 = vector.shape_cast %27 : vector<1x4x288xf32> to vector<4x288xf32>
    %cst_27 = arith.constant dense<0.000000e+00> : vector<8x288xf32>
    %29 = tpu.matmul %26, %28, %cst_27 {dimension_numbers = #tpu.dot_dimension_numbers<[1], [0], [0], [1], [0, 0, 1, 1], [], []>} : vector<8x4xf32>, vector<4x288xf32>, vector<8x288xf32> -> vector<8x288xf32>
    %30 = arith.addf %24, %29 : vector<8x288xf32>
    %c5 = arith.constant 5 : index
    %c0_28 = arith.constant 0 : index
    %c0_29 = arith.constant 0 : index
    %31 = vector.load %arg3[%c5, %c0_28, %c0_29] : memref<9x8x4xf32, #tpu.memory_space<vmem>>, vector<1x8x4xf32>
    %32 = vector.shape_cast %31 : vector<1x8x4xf32> to vector<8x4xf32>
    %c0_30 = arith.constant 0 : index
    %c0_31 = arith.constant 0 : index
    %c20 = arith.constant 20 : index
    %33 = vector.load %arg2[%c0_30, %c0_31, %c20] : memref<1x4x342xf32, #tpu.memory_space<vmem>>, vector<1x4x288xf32>
    %34 = vector.shape_cast %33 : vector<1x4x288xf32> to vector<4x288xf32>
    %cst_32 = arith.constant dense<0.000000e+00> : vector<8x288xf32>
    %35 = tpu.matmul %32, %34, %cst_32 {dimension_numbers = #tpu.dot_dimension_numbers<[1], [0], [0], [1], [0, 0, 1, 1], [], []>} : vector<8x4xf32>, vector<4x288xf32>, vector<8x288xf32> -> vector<8x288xf32>
    %36 = arith.addf %30, %35 : vector<8x288xf32>
    %c6 = arith.constant 6 : index
    %c0_33 = arith.constant 0 : index
    %c0_34 = arith.constant 0 : index
    %37 = vector.load %arg3[%c6, %c0_33, %c0_34] : memref<9x8x4xf32, #tpu.memory_space<vmem>>, vector<1x8x4xf32>
    %38 = vector.shape_cast %37 : vector<1x8x4xf32> to vector<8x4xf32>
    %c0_35 = arith.constant 0 : index
    %c0_36 = arith.constant 0 : index
    %c36 = arith.constant 36 : index
    %39 = vector.load %arg2[%c0_35, %c0_36, %c36] : memref<1x4x342xf32, #tpu.memory_space<vmem>>, vector<1x4x288xf32>
    %40 = vector.shape_cast %39 : vector<1x4x288xf32> to vector<4x288xf32>
    %cst_37 = arith.constant dense<0.000000e+00> : vector<8x288xf32>
    %41 = tpu.matmul %38, %40, %cst_37 {dimension_numbers = #tpu.dot_dimension_numbers<[1], [0], [0], [1], [0, 0, 1, 1], [], []>} : vector<8x4xf32>, vector<4x288xf32>, vector<8x288xf32> -> vector<8x288xf32>
    %42 = arith.addf %36, %41 : vector<8x288xf32>
    %c7 = arith.constant 7 : index
    %c0_38 = arith.constant 0 : index
    %c0_39 = arith.constant 0 : index
    %43 = vector.load %arg3[%c7, %c0_38, %c0_39] : memref<9x8x4xf32, #tpu.memory_space<vmem>>, vector<1x8x4xf32>
    %44 = vector.shape_cast %43 : vector<1x8x4xf32> to vector<8x4xf32>
    %c0_40 = arith.constant 0 : index
    %c0_41 = arith.constant 0 : index
    %c37 = arith.constant 37 : index
    %45 = vector.load %arg2[%c0_40, %c0_41, %c37] : memref<1x4x342xf32, #tpu.memory_space<vmem>>, vector<1x4x288xf32>
    %46 = vector.shape_cast %45 : vector<1x4x288xf32> to vector<4x288xf32>
    %cst_42 = arith.constant dense<0.000000e+00> : vector<8x288xf32>
    %47 = tpu.matmul %44, %46, %cst_42 {dimension_numbers = #tpu.dot_dimension_numbers<[1], [0], [0], [1], [0, 0, 1, 1], [], []>} : vector<8x4xf32>, vector<4x288xf32>, vector<8x288xf32> -> vector<8x288xf32>
    %48 = arith.addf %42, %47 : vector<8x288xf32>
    %c8 = arith.constant 8 : index
    %c0_43 = arith.constant 0 : index
    %c0_44 = arith.constant 0 : index
    %49 = vector.load %arg3[%c8, %c0_43, %c0_44] : memref<9x8x4xf32, #tpu.memory_space<vmem>>, vector<1x8x4xf32>
    %50 = vector.shape_cast %49 : vector<1x8x4xf32> to vector<8x4xf32>
    %c0_45 = arith.constant 0 : index
    %c0_46 = arith.constant 0 : index
    %c38 = arith.constant 38 : index
    %51 = vector.load %arg2[%c0_45, %c0_46, %c38] : memref<1x4x342xf32, #tpu.memory_space<vmem>>, vector<1x4x288xf32>
    %52 = vector.shape_cast %51 : vector<1x4x288xf32> to vector<4x288xf32>
    %cst_47 = arith.constant dense<0.000000e+00> : vector<8x288xf32>
    %53 = tpu.matmul %50, %52, %cst_47 {dimension_numbers = #tpu.dot_dimension_numbers<[1], [0], [0], [1], [0, 0, 1, 1], [], []>} : vector<8x4xf32>, vector<4x288xf32>, vector<8x288xf32> -> vector<8x288xf32>
    %54 = arith.addf %48, %53 : vector<8x288xf32>
    %c0_48 = arith.constant 0 : index
    %c0_49 = arith.constant 0 : index
    %55 = vector.load %arg4[%c0_48, %c0_49] : memref<8x1xf32, #tpu.memory_space<vmem>>, vector<8x1xf32>
    %56 = vector.broadcast %55 : vector<8x1xf32> to vector<8x288xf32>
    %57 = arith.addf %54, %56 : vector<8x288xf32>
    %cst_50 = arith.constant 0.000000e+00 : f32
    %58 = vector.broadcast %cst_50 : f32 to vector<8x288xf32>
    %59 = arith.maximumf %57, %58 : vector<8x288xf32>
    %c0_51 = arith.constant 0 : index
    %c0_52 = arith.constant 0 : index
    %c0_53 = arith.constant 0 : index
    %60 = vector.load %arg5[%c0_51, %c0_52, %c0_53] : memref<1x8x288xf32, #tpu.memory_space<vmem>>, vector<1x8x288xf32>
    %61 = vector.shape_cast %60 : vector<1x8x288xf32> to vector<8x288xf32>
    %62 = vector.shape_cast %59 : vector<8x288xf32> to vector<1x8x288xf32>
    tpu.vector_store %arg5[%c0_51, %c0_52, %c0_53], %62 {strides = array<i32>} : memref<1x8x288xf32, #tpu.memory_space<vmem>>, vector<1x8x288xf32>,
    return
  }
  func.func @transform_0(%arg0: i32, %arg1: i32) -> (i32, i32, i32) {
    %c0_i32 = arith.constant 0 : i32
    %c0_i32_0 = arith.constant 0 : i32
    %c0_i32_1 = arith.constant 0 : i32
    return %arg0, %c0_i32, %c0_i32_0 : i32, i32, i32
  }
  func.func @transform_1(%arg0: i32, %arg1: i32) -> (i32, i32, i32) {
    %c0_i32 = arith.constant 0 : i32
    %c0_i32_0 = arith.constant 0 : i32
    %c0_i32_1 = arith.constant 0 : i32
    return %c0_i32, %arg1, %c0_i32_0 : i32, i32, i32
  }
  func.func @transform_2(%arg0: i32, %arg1: i32) -> (i32, i32) {
    %c0_i32 = arith.constant 0 : i32
    %c0_i32_0 = arith.constant 0 : i32
    return %arg1, %c0_i32 : i32, i32
  }
  func.func @transform_3(%arg0: i32, %arg1: i32) -> (i32, i32, i32) {
    %c0_i32 = arith.constant 0 : i32
    %c0_i32_0 = arith.constant 0 : i32
    return %arg0, %arg1, %c0_i32 : i32, i32, i32
  }
}

</mosaic_0001>

<bundles_post_ra>
// kernel: single_conv_forward.1
= control target key start
LH: loop header
LB: loop body
LE: loop exit
PB: predicated region body
PF: predicated region fallthrough
CT: control target
= control target key end

     0   :  { %s2096_s12 = smov 0   ;;  %s2098_s13 = smov 0   ;;  %s2282_s0 = inlined_call_operand.vmem [shape: f32[2,4,342], index: 0, kind: input, shape index: {}]   ;;  %s2283_s1 = inlined_call_operand.vmem [shape: f32[9,8,4], index: 1, kind: input, shape index: {}]   ;;  %s2284_s2 = inlined_call_operand.vmem [shape: f32[8,1], index: 2, kind: input, shape index: {}]   ;;  %s2285_s3 = inlined_call_operand.vmem [shape: f32[2,8,288], index: 3, kind: output, shape index: {}]  }
   0x1   :  { %s2100_s14 = smov 0  }
   0x2 LB: > { %s25_s15 = sadd.s32 1, %s2059_s13  ;;  %p1865_p0 = scmp.ge.s32.totalorder %s2063_s14, 1  ;;  %s2063_s14 = sphi %s2100_s14, %s13_s14   ;;  %s2059_s13 = sphi %s2098_s13, %s2287_s13   ;;  %s2055_s12 = sphi %s2096_s12, %s2286_s12  }
   0x3   : > { %p27_p1 = scmp.ge.s32.totalorder %s25_s15, 2  ;;  %p169_p2 = scmp.lt.s32.totalorder %s2063_s14, 3 }
   0x5   : > { %s2289_s15 = smov (%p27_p1, %s25_s15), 0  ;;  %p170_p3 = pnand %p1865_p0, %p169_p2 }
   0x6   : > { %p205_p4 = scmp.lt.s32.totalorder (!%p170_p3), %s2055_s12, 1  ;;  %v2065_v0 = vmov (!%p170_p3), 0.0   ;;  %vm2066_vm0 = vmmov (!%p170_p3), 0   ;;  %s2067_s20 = smov (!%p170_p3), 127   ;;  %v1729_v11 = vld [vmem:[%s2284_s2] sm:$0xff] (!%p170_p3)  ;;  %v2075_v12 = vmov (!%p170_p3), 0  }
   0x7   : > { %173 = sbr.rel (%p170_p3) target bundleno = 425 (0x1a9), region = 32  ;;  %1941 = vmatprep.subr.mxu1 (!%p170_p3), %v2065_v0  ;;  %319 = vmatprep.mubr.f32.mxu0 (!%p170_p3), %v2065_v0  ;;  %s2068_s21 = smov (!%p170_p3), 126   ;;  %vm248_vm1 = vcmask (!%p170_p3), 1043456   ;;  %vm241_vm2 = vcmask (!%p170_p3), 1039360   ;;  %v1868_v18 = vld [vmem:[%s2283_s1 + $0x8] sm:$0xff] (!%p170_p3)  ;;  %vm244_vm3 = vcmask (!%p170_p3), 31744  }
   0x8   : > { %1943 = vmatprep.mubr.msk.f32.mxu1 (!%p170_p3), %vm2066_vm0, %v2065_v0  ;;  %s2069_s22 = smov (!%p170_p3), 110   ;;  %s2070_s23 = smov (!%p170_p3), 109   ;;  %2039 = vset.pattern.permute.xlu0 (!%p170_p3), %v2075_v12  ;;  %vm559_vm4 = vcmask (!%p170_p3), 1031168   ;;  %v227_v24 = vld [vmem:[%s2283_s1] sm:$0xff] (!%p170_p3)  ;;  %vm728_vm5 = vcmask (!%p170_p3), 900096   ;;  %v1879_v29 = vld [vmem:[%s2283_s1 + $0x10] sm:$0xff] (!%p170_p3) }
   0x9   : > { %s2071_s24 = smov (!%p170_p3), 108   ;;  %s2072_s25 = smov (!%p170_p3), 92   ;;  %v1885_v31 = vld [vmem:[%s2283_s1 + $0x18] sm:$0xff] (!%p170_p3)  ;;  %vm897_vm6 = vcmask (!%p170_p3), 891904   ;;  %v1891_v34 = vld [vmem:[%s2283_s1 + $0x20] sm:$0xff] (!%p170_p3)  ;;  %v1897_v39 = vld [vmem:[%s2283_s1 + $0x28] sm:$0xff] (!%p170_p3) }
   0xa   : > { %s2073_s26 = smov (!%p170_p3), 91   ;;  %s2074_s27 = smov (!%p170_p3), 90   ;;  %vm1066_vm7 = vcmask (!%p170_p3), 883712   ;;  %v1903_v46 = vld [vmem:[%s2283_s1 + $0x30] sm:$0xff] (!%p170_p3)  ;;  %vm1235_vm8 = vcmask (!%p170_p3), 752640   ;;  %v1909_v49 = vld [vmem:[%s2283_s1 + $0x38] sm:$0xff] (!%p170_p3) }
   0xb   : > { %v1915_v53 = vld [vmem:[%s2283_s1 + $0x40] sm:$0xff] (!%p170_p3)  ;;  %vm1404_vm9 = vcmask (!%p170_p3), 744448   ;;  %vm1573_vm10 = vcmask (!%p170_p3), 736256   ;;  %vm1743_vm11 = vcmask (!%p170_p3), 261120  }
   0xe   : > { %s2291_s12 = smov (!%p205_p4, %s2055_s12), 1 }
   0xf   : > { %s2002_s16 = smul.u32 12, %s2291_s12 }
  0x11   : > { %s2122_s19 = scalar_lea.vmem %s2282_s0, %s2002_s16 }
  0x12   : > { %v2127_v1 = vld [vmem:[%s2122_s19] sm:$0xff]  ;;  %v2133_v3 = vld [vmem:[%s2122_s19 + $0x8] sm:$0xf] }
  0x13   : > { %235 = vrot.lane.b32.xlu1 %v2127_v1, %s2067_s20  ;;  %v234_v2 = vcombine.high %v2127_v1, %v2127_v1  ;;  %v549_v4 = vld [vmem:[%s2122_s19 + $0x8] sm:$0xf] }
  0x14   : > { %v718_v5 = vld [vmem:[%s2122_s19 + $0x8] sm:$0xf] }
  0x15   : > { %237 = vrot.lane.b32.xlu0 %v234_v2, %s2067_s20  ;;  %v887_v6 = vld [vmem:[%s2122_s19 + $0x8] sm:$0xf] }
  0x16   : > { %v1056_v7 = vld [vmem:[%s2122_s19 + $0x8] sm:$0xf] }
  0x17   : > { %555 = vrot.lane.b32.xlu1 %v234_v2, %s2068_s21  ;;  %v1225_v8 = vld [vmem:[%s2122_s19 + $0x8] sm:$0xf] }
  0x18   : > { %v1394_v9 = vld [vmem:[%s2122_s19 + $0x8] sm:$0xf] }
  0x19   : > { %239 = vrot.lane.b32.xlu0 %v2133_v3, %s2067_s20  ;;  %v1563_v10 = vld [vmem:[%s2122_s19 + $0x8] sm:$0xf] }
  0x1b   : > { %553 = vrot.lane.b32.xlu1 %v2127_v1, %s2068_s21 }
  0x1d   : > { %557 = vrot.lane.b32.xlu0 %v549_v4, %s2068_s21 }
  0x1f   : > { %726 = vrot.lane.b32.xlu1 %v718_v5, %s2069_s22 }
  0x21   : > { %724 = vrot.lane.b32.xlu0 %v234_v2, %s2069_s22 }
  0x23   : > { %893 = vrot.lane.b32.xlu1 %v234_v2, %s2070_s23 }
  0x25   : > { %722 = vrot.lane.b32.xlu0 %v2127_v1, %s2069_s22 }
  0x27   : > { %891 = vrot.lane.b32.xlu1 %v2127_v1, %s2070_s23 }
  0x29   : > { %895 = vrot.lane.b32.xlu0 %v887_v6, %s2070_s23 }
  0x2b   : > { %1064 = vrot.lane.b32.xlu1 %v1056_v7, %s2071_s24 }
  0x2d   : > { %1062 = vrot.lane.b32.xlu0 %v234_v2, %s2071_s24 }
  0x2f   : > { %1231 = vrot.lane.b32.xlu1 %v234_v2, %s2072_s25 }
  0x31   : > { %1060 = vrot.lane.b32.xlu0 %v2127_v1, %s2071_s24 }
  0x33   : > { %1229 = vrot.lane.b32.xlu1 %v2127_v1, %s2072_s25 }
  0x35   : > { %1233 = vrot.lane.b32.xlu0 %v1225_v8, %s2072_s25  ;;  %s2003_s25 = smul.u32 24, %s2291_s12 }
  0x37   : > { %1402 = vrot.lane.b32.xlu1 %v1394_v9, %s2073_s26  ;;  %s226_s28 = scalar_lea.vmem %s2285_s3, %s2003_s25 }
  0x39   : > { %1400 = vrot.lane.b32.xlu0 %v234_v2, %s2073_s26 }
  0x3b   : > { %1569 = vrot.lane.b32.xlu1 %v234_v2, %s2074_s27 }
  0x3d   : > { %1398 = vrot.lane.b32.xlu0 %v2127_v1, %s2073_s26 }
  0x3f   : > { %1567 = vrot.lane.b32.xlu1 %v2127_v1, %s2074_s27 }
  0x41   : > { %1571 = vrot.lane.b32.xlu0 %v1563_v10, %s2074_s27 }
  0x45   : > { %1732 = vperm.xlu0 %2039, %v1729_v11  }
  0x85   : > { %v236_v13 = vpop.permute.xlu1 %235 }
  0x87   : > { %v238_v14 = vpop.permute.xlu0 %237 }
  0x88   : > { %v242_v19 = vsel %vm241_vm2, %v236_v13, %v238_v14 }
  0x89   : > { %v556_v15 = vpop.permute.xlu1 %555 }
  0x8b   : > { %v240_v16 = vpop.permute.xlu0 %239 }
  0x8c   : > { %1942 = vmatpush3.msk.msra.mxu1 %vm248_vm1, %v240_v16  ;;  %v243_v17 = vsel %vm241_vm2, %v238_v14, %v240_v16 }
  0x8d   : > { %1869 = vmatprep.subr.msk.mxu0 %vm248_vm1, %v243_v17  ;;  %v554_v20 = vpop.permute.xlu1 %553  ;;  %1944 = vmatmul.mubr.msk.f32.vlgmr.msra.gmra.mrb[0].mxu1 %vm244_vm3, %v1868_v18 }
  0x8e   : > { %1870 = vmatpush1.msk.msra.mxu0 %vm248_vm1, %v242_v19  ;;  %1946 = vmatprep.subr.mxu1 %v2065_v0  ;;  %v560_v26 = vsel %vm559_vm4, %v554_v20, %v556_v15 }
  0x8f   : > { %1871 = vmatmul.mubr.msk.f32.vlgmr.msra.gmra.mrb[0].mxu0 %vm244_vm3, %v1868_v18  ;;  %1874 = vmatprep.subr.msk.mxu0 %vm248_vm1, %v234_v2  ;;  %v558_v21 = vpop.permute.xlu0 %557 }
  0x90   : > { %1875 = vmatpush1.msk.msra.mxu0 %vm248_vm1, %v2127_v1  ;;  %v561_v22 = vsel %vm559_vm4, %v556_v15, %v558_v21  ;;  %1947 = vmatpush3.msk.msra.mxu1 %vm248_vm1, %v2133_v3 }
  0x91   : > { %1880 = vmatprep.subr.msk.mxu0 %vm248_vm1, %v561_v22  ;;  %1948 = vmatprep.mubr.msk.f32.mxu1 %vm2066_vm0, %v2065_v0  ;;  %v727_v23 = vpop.permute.xlu1 %726 }
  0x92   : > { %1951 = vmatprep.subr.mxu1 %v2065_v0  ;;  %469 = vmatprep.mubr.f32.mxu0 %v2065_v0 }
  0x93   : > { %1949 = vmatmul.mubr.msk.f32.vlgmr.msra.gmra.mrb[2].mxu1 %vm244_vm3, %v227_v24  ;;  %v725_v25 = vpop.permute.xlu0 %724 }
  0x94   : > { %1952 = vmatpush3.msk.msra.mxu1 %vm248_vm1, %v558_v21  ;;  %1953 = vmatprep.mubr.msk.f32.mxu1 %vm2066_vm0, %v2065_v0  ;;  %v730_v28 = vsel %vm728_vm5, %v725_v25, %v727_v23 }
  0x95   : > { %1956 = vmatprep.subr.mxu1 %v2065_v0  ;;  %v894_v27 = vpop.permute.xlu1 %893 }
  0x97   : > { %1876 = vmatmul.mubr.msk.f32.vlgmr.msra.gmra.mrb[0].mxu0 %vm244_vm3, %v227_v24  ;;  %v723_v30 = vpop.permute.xlu0 %722  ;;  %1954 = vmatmul.mubr.msk.f32.vlgmr.msra.gmra.mrb[4].mxu1 %vm244_vm3, %v1879_v29 }
  0x98   : > { %1881 = vmatpush1.msk.msra.mxu0 %vm248_vm1, %v560_v26  ;;  %635 = vmatprep.mubr.f32.mxu0 %v2065_v0  ;;  %v729_v35 = vsel %vm728_vm5, %v723_v30, %v725_v25 }
  0x99   : > { %1886 = vmatprep.subr.msk.mxu0 %vm248_vm1, %v730_v28  ;;  %1957 = vmatpush3.msk.msra.mxu1 %vm248_vm1, %v727_v23  ;;  %v892_v32 = vpop.permute.xlu1 %891 }
  0x9a   : > { %1958 = vmatprep.mubr.msk.f32.mxu1 %vm2066_vm0, %v2065_v0  ;;  %1961 = vmatprep.subr.mxu1 %v2065_v0  ;;  %v898_v42 = vsel %vm897_vm6, %v892_v32, %v894_v27 }
  0x9b   : > { %v896_v33 = vpop.permute.xlu0 %895  ;;  %1959 = vmatmul.mubr.msk.f32.vlgmr.msra.gmra.mrb[6].mxu1 %vm244_vm3, %v1885_v31 }
  0x9c   : > { %1962 = vmatpush3.msk.msra.mxu1 %vm248_vm1, %v896_v33  ;;  %1963 = vmatprep.mubr.msk.f32.mxu1 %vm2066_vm0, %v2065_v0  ;;  %v899_v37 = vsel %vm897_vm6, %v894_v27, %v896_v33 }
  0x9d   : > { %v1065_v36 = vpop.permute.xlu1 %1064  ;;  %1966 = vmatprep.subr.mxu1 %v2065_v0 }
  0x9f   : > { %1882 = vmatmul.mubr.msk.f32.vlgmr.msra.gmra.mrb[0].mxu0 %vm244_vm3, %v1879_v29  ;;  %v1063_v38 = vpop.permute.xlu0 %1062  ;;  %1964 = vmatmul.mubr.msk.f32.vlgmr.msra.gmra.mrb[8].mxu1 %vm244_vm3, %v1891_v34 }
  0xa0   : > { %1887 = vmatpush1.msk.msra.mxu0 %vm248_vm1, %v729_v35  ;;  %804 = vmatprep.mubr.f32.mxu0 %v2065_v0  ;;  %v1068_v44 = vsel %vm1066_vm7, %v1063_v38, %v1065_v36 }
  0xa1   : > { %1892 = vmatprep.subr.msk.mxu0 %vm248_vm1, %v899_v37  ;;  %v1232_v40 = vpop.permute.xlu1 %1231  ;;  %1967 = vmatpush3.msk.msra.mxu1 %vm248_vm1, %v1065_v36 }
  0xa2   : > { %1968 = vmatprep.mubr.msk.f32.mxu1 %vm2066_vm0, %v2065_v0  ;;  %1971 = vmatprep.subr.mxu1 %v2065_v0 }
  0xa3   : > { %v1061_v41 = vpop.permute.xlu0 %1060  ;;  %1969 = vmatmul.mubr.msk.f32.vlgmr.msra.gmra.mrb[10].mxu1 %vm244_vm3, %v1897_v39 }
  0xa4   : > { %1973 = vmatprep.mubr.msk.f32.mxu1 %vm2066_vm0, %v2065_v0  ;;  %v1067_v50 = vsel %vm1066_vm7, %v1061_v41, %v1063_v38 }
  0xa5   : > { %v1230_v43 = vpop.permute.xlu1 %1229 }
  0xa6   : > { %v1236_v55 = vsel %vm1235_vm8, %v1230_v43, %v1232_v40 }
  0xa7   : > { %1888 = vmatmul.mubr.msk.f32.vlgmr.msra.gmra.mrb[0].mxu0 %vm244_vm3, %v1885_v31  ;;  %v1234_v45 = vpop.permute.xlu0 %1233 }
  0xa8   : > { %1893 = vmatpush1.msk.msra.mxu0 %vm248_vm1, %v898_v42  ;;  %973 = vmatprep.mubr.f32.mxu0 %v2065_v0  ;;  %v1237_v51 = vsel %vm1235_vm8, %v1232_v40, %v1234_v45 }
  0xa9   : > { %1898 = vmatprep.subr.msk.mxu0 %vm248_vm1, %v1068_v44  ;;  %1972 = vmatpush3.msk.msra.mxu1 %vm248_vm1, %v1234_v45  ;;  %v1403_v47 = vpop.permute.xlu1 %1402 }
  0xaa   : > { %1974 = vmatmul.mubr.msk.f32.vlgmr.msra.gmra.mrb[12].mxu1 %vm244_vm3, %v1903_v46  ;;  %1976 = vmatprep.subr.mxu1 %v2065_v0 }
  0xab   : > { %v1401_v48 = vpop.permute.xlu0 %1400  ;;  %1977 = vmatpush3.msk.msra.mxu1 %vm248_vm1, %v1403_v47  ;;  %1978 = vmatprep.mubr.msk.f32.mxu1 %vm2066_vm0, %v2065_v0 }
  0xac   : > { %1981 = vmatprep.subr.mxu1 %v2065_v0  ;;  %v1406_v56 = vsel %vm1404_vm9, %v1401_v48, %v1403_v47 }
  0xad   : > { %v1570_v57 = vpop.permute.xlu1 %1569 }
  0xae   : > { %1979 = vmatmul.mubr.msk.f32.vlgmr.msra.gmra.mrb[14].mxu1 %vm244_vm3, %v1909_v49 }
  0xaf   : > { %1894 = vmatmul.mubr.msk.f32.vlgmr.msra.gmra.mrb[0].mxu0 %vm244_vm3, %v1891_v34  ;;  %v1399_v52 = vpop.permute.xlu0 %1398  ;;  %1983 = vmatprep.mubr.msk.f32.mxu1 %vm2066_vm0, %v2065_v0 }
  0xb0   : > { %1899 = vmatpush1.msk.msra.mxu0 %vm248_vm1, %v1067_v50  ;;  %1142 = vmatprep.mubr.f32.mxu0 %v2065_v0  ;;  %v1405_v58 = vsel %vm1404_vm9, %v1399_v52, %v1401_v48 }
  0xb1   : > { %1904 = vmatprep.subr.msk.mxu0 %vm248_vm1, %v1237_v51  ;;  %v1568_v60 = vpop.permute.xlu1 %1567 }
  0xb2   : > { %v1574_v61 = vsel %vm1573_vm10, %v1568_v60, %v1570_v57 }
  0xb3   : > { %v1572_v54 = vpop.permute.xlu0 %1571 }
  0xb4   : > { %1982 = vmatpush3.msk.msra.mxu1 %vm248_vm1, %v1572_v54  ;;  %v1575_v59 = vsel %vm1573_vm10, %v1570_v57, %v1572_v54 }
  0xb5   : > { %1984 = vmatmul.mubr.msk.f32.vlgmr.msra.gmra.mrb[16].mxu1 %vm244_vm3, %v1915_v53 }
  0xb7   : > { %1900 = vmatmul.mubr.msk.f32.vlgmr.msra.gmra.mrb[0].mxu0 %vm244_vm3, %v1897_v39 }
  0xb8   : > { %1905 = vmatpush1.msk.msra.mxu0 %vm248_vm1, %v1236_v55  ;;  %1311 = vmatprep.mubr.f32.mxu0 %v2065_v0 }
  0xb9   : > { %1910 = vmatprep.subr.msk.mxu0 %vm248_vm1, %v1406_v56 }
  0xbf   : > { %1906 = vmatmul.mubr.msk.f32.vlgmr.msra.gmra.mrb[0].mxu0 %vm244_vm3, %v1903_v46 }
  0xc0   : > { %1911 = vmatpush1.msk.msra.mxu0 %vm248_vm1, %v1405_v58  ;;  %1480 = vmatprep.mubr.f32.mxu0 %v2065_v0 }
  0xc1   : > { %1916 = vmatprep.subr.msk.mxu0 %vm248_vm1, %v1575_v59 }
  0xc4   : > { %v1733_v22 = vpop.permute.xlu0 %1732 }
  0xc7   : > { %1912 = vmatmul.mubr.msk.f32.vlgmr.msra.gmra.mrb[0].mxu0 %vm244_vm3, %v1909_v49 }
  0xc8   : > { %1917 = vmatpush1.msk.msra.mxu0 %vm248_vm1, %v1574_v61  ;;  %1649 = vmatprep.mubr.f32.mxu0 %v2065_v0 }
  0xcf   : > { %1918 = vmatmul.mubr.msk.f32.vlgmr.msra.gmra.mrb[0].mxu0 %vm244_vm3, %v1915_v53 }
 0x160   : > { %v392_v62 = vpop.f32.mrb[0].mxu1 }
 0x161   : > { %v1945_v63 = vpop.f32.mrb[1].mxu1 }
 0x166   : > { %v542_v1 = vpop.f32.mrb[2].mxu1 }
 0x167   : > { %v543_v2 = vadd.f32 %v542_v1, %v392_v62  ;;  %v1950_v3 = vpop.f32.mrb[3].mxu1 }
 0x16a   : > { %v708_v4 = vpop.f32.mrb[4].mxu1 }
 0x16b   : > { %v714_v5 = vadd.f32 %v708_v4, %v543_v2  ;;  %v1955_v6 = vpop.f32.mrb[5].mxu1 }
 0x16e   : > { %v877_v7 = vpop.f32.mrb[6].mxu1 }
 0x16f   : > { %v883_v8 = vadd.f32 %v877_v7, %v714_v5  ;;  %v1960_v9 = vpop.f32.mrb[7].mxu1 }
 0x172   : > { %v1046_v10 = vpop.f32.mrb[8].mxu1 }
 0x173   : > { %v1052_v11 = vadd.f32 %v1046_v10, %v883_v8  ;;  %v1965_v12 = vpop.f32.mrb[9].mxu1 }
 0x176   : > { %v1215_v13 = vpop.f32.mrb[10].mxu1 }
 0x177   : > { %v1221_v14 = vadd.f32 %v1215_v13, %v1052_v11  ;;  %v1970_v0 = vpop.f32.mrb[11].mxu1 }
 0x17d   : > { %v1384_v15 = vpop.f32.mrb[12].mxu1 }
 0x17e   : > { %v1390_v16 = vadd.f32 %v1384_v15, %v1221_v14  ;;  %v1975_v17 = vpop.f32.mrb[13].mxu1 }
 0x181   : > { %v1553_v18 = vpop.f32.mrb[14].mxu1 }
 0x182   : > { %v1559_v19 = vadd.f32 %v1553_v18, %v1390_v16  ;;  %v1980_v20 = vpop.f32.mrb[15].mxu1 }
 0x188   : > { %v1722_v21 = vpop.f32.mrb[16].mxu1 }
 0x189   : > { %v1728_v23 = vadd.f32 %v1722_v21, %v1559_v19  ;;  %v1985_v24 = vpop.f32.mrb[17].mxu1 }
 0x18b   : > { %v1737_v25 = vadd.f32 %v1733_v22, %v1728_v23 }
 0x18d   : > { %v1740_v26 = vmax.f32 %v1737_v25, 0.0 }
 0x18f   : > { %1744 = vst.msk [vmem:[%s226_s28 + $0x10] sm:$0xff] %vm1743_vm11, %v1740_v26 }
 0x1a2   : > { %v1651_v27 = vpop.f32.mrb[0].mxu0 }
 0x1a3   : > { %v1735_v28 = vadd.f32 %v1733_v22, %v1651_v27  ;;  %v1653_v29 = vpop.f32.mrb[1].mxu0 }
 0x1a4   : > { %v1736_v30 = vadd.f32 %v1733_v22, %v1653_v29 }
 0x1a5   : > { %v1738_v31 = vmax.f32 %v1735_v28, 0.0 }
 0x1a6   : > { %v1739_v32 = vmax.f32 %v1736_v30, 0.0 }
 0x1a7   : > { %1741 = vst [vmem:[%s226_s28] sm:$0xff] %v1738_v31 }
 0x1a8   : > { %1742 = vst [vmem:[%s226_s28 + $0x8] sm:$0xff] %v1739_v32 }
 0x1a9 PF: > { %s13_s14 = sadd.s32 1, %s2063_s14   ;;  %s2286_s12 = smov %s2059_s13 }
 0x1aa   : > { %p10_p5 = scmp.ge.s32.totalorder %s13_s14, 4   ;;  %s2287_s13 = smov %s2289_s15 }
 0x1ac   :  { %12 = sbr.rel (!%p10_p5) target bundleno = 2 (0x2), region = 76 }

</bundles_post_ra>
